<compile_context>
chip_gen: v7x
topology: tpu7x:2x2x1
jax: 0.10.0
libtpu: 0.0.40
codegen_flags: <defaults>
</compile_context>

<pallas_src>
import jax
import jax.numpy as jnp
from jax.experimental import pallas as pl
from jax.experimental.pallas import tpu as pltpu


def _round_up(x: int, m: int) -> int:
    return ((x + m - 1) // m) * m


def _tpu_config():
    """Return (physical VMEM bytes per TensorCore, chip shards grid over 2 TCs)."""
    kind = ""
    try:
        kind = jax.devices()[0].device_kind.lower().replace(" ", "")
    except Exception:
        pass
    if "v7" in kind or "tpu7" in kind:
        return 64 << 20, True                 # v7x: 64 MiB / TC, 2 TCs per chip
    if any(s in kind for s in ("v4", "v5", "v6")):
        return 128 << 20, False               # v4 / v5e / v5p / v6e: 128 MiB, 1 TC
    try:                                       # unknown name: ask Mosaic
        vmem = int(pltpu.get_tpu_info().vmem_capacity_bytes)
        return vmem, vmem <= (64 << 20)
    except Exception:
        return 64 << 20, False                 # conservative fallback


def _choose_tiles(M, dim_in, dim_ff, x_bytes, out_bytes, vmem_budget, two_cores):
    """Pick (tile_m, tile_ff) that fit vmem_budget and minimize HBM+MXU cost."""
    m_al = _round_up(max(M, 1), 8)
    ff_al = _round_up(max(dim_ff, 1), 128)

    def fits(tm, tk):
        # Every BlockSpec operand is double-buffered by the pipeline; the f32
        # accumulator scratch (only for non-f32 outputs) is single-buffered.
        dbl = 2 * (tm * dim_in * x_bytes        # x tile
                   + dim_in * tk * 2            # W1 slice (bf16)
                   + tk * dim_in * 2            # W2 slice (bf16)
                   + tm * dim_in * out_bytes    # output tile
                   + tk * 4 + dim_in * 4)       # biases (f32)
        acc = 0 if out_bytes == 4 else tm * dim_in * 4
        return dbl + acc <= vmem_budget

    tm_opts = [t for t in (1024, 768, 512, 384, 256, 192, 128, 64, 32, 16, 8)
               if t <= m_al] or [m_al]
    tk_opts = [t for t in (2048, 1536, 1024, 768, 512, 384, 256, 128)
               if t <= ff_al] or [ff_al]

    feas = [t for t in tm_opts if fits(t, tk_opts[-1])] or [tm_opts[-1]]

    # Cost model: W1/W2 are re-streamed from HBM once per M tile; padded rows
    # still pay activation bytes + MXU time (flops converted to byte-equivalents).
    w_bytes = 2 * dim_in * dim_ff * 2
    row_cost = dim_in * (x_bytes + out_bytes) + (4 * dim_in * dim_ff) // 700

    def score(tm):
        m_pad = _round_up(M, tm)
        n_tiles = m_pad // tm
        starved = 1 if (two_cores and n_tiles < 2 and m_al >= 16) else 0
        return (starved, n_tiles * w_bytes + m_pad * row_cost, -tm)

    tm = min(feas, key=score)
    tk = next((t for t in tk_opts if fits(tm, t)), tk_opts[-1])
    return tm, tk


def ffn_kernel_f32out(x_ref, w1_ref, b1_ref, w2_ref, b2_ref, o_ref):
    """Grid = (M tiles, dim_ff chunks); axis 1 is a reduction over dim_ff.

    f32 output: accumulate directly into the (k-invariant) output block, seeded
    with b2 at k == 0 — no separate VMEM accumulator scratch needed.
    """
    k = pl.program_id(1)

    @pl.when(k == 0)
    def _():
        o_ref[...] = jnp.broadcast_to(b2_ref[...], o_ref.shape)

    x = x_ref[...].astype(jnp.bfloat16)
    h = jnp.dot(x, w1_ref[...], preferred_element_type=jnp.float32)
    h = jnp.maximum(h + b1_ref[...], 0.0)
    o_ref[...] += jnp.dot(h.astype(jnp.bfloat16), w2_ref[...],
                          preferred_element_type=jnp.float32)


def ffn_kernel_acc(x_ref, w1_ref, b1_ref, w2_ref, b2_ref, o_ref, acc_ref):
    """Same as above but with an f32 VMEM accumulator for non-f32 outputs."""
    k = pl.program_id(1)

    @pl.when(k == 0)
    def _():
        acc_ref[...] = jnp.zeros_like(acc_ref)

    x = x_ref[...].astype(jnp.bfloat16)
    h = jnp.dot(x, w1_ref[...], preferred_element_type=jnp.float32)
    h = jnp.maximum(h + b1_ref[...], 0.0)
    acc_ref[...] += jnp.dot(h.astype(jnp.bfloat16), w2_ref[...],
                            preferred_element_type=jnp.float32)

    @pl.when(k == pl.num_programs(1) - 1)
    def _():
        o_ref[...] = (acc_ref[...] + b2_ref[...]).astype(o_ref.dtype)


def feed_forward(x, w1, b1, w2, b2, *, tile_m=None, tile_ff=None):
    """y = relu(x @ w1 + b1) @ w2 + b2.  x: (M, dim_in) -> (M, dim_in).

    dim_in is assumed lane-aligned (multiple of 128), as in the module defaults.
    """
    M, dim_in = x.shape
    dim_ff = w1.shape[1]
    out_dtype = x.dtype
    x_bytes = jnp.dtype(x.dtype).itemsize
    out_bytes = jnp.dtype(out_dtype).itemsize

    phys_vmem, two_cores = _tpu_config()
    vmem_limit = int(phys_vmem * 0.85)   # headroom for compiler-internal scratch
    tile_budget = int(phys_vmem * 0.70)  # tile-selection target, below the limit

    tm_auto, tk_auto = _choose_tiles(M, dim_in, dim_ff, x_bytes, out_bytes,
                                     tile_budget, two_cores)
    tm = tile_m if tile_m is not None else tm_auto
    tk = tile_ff if tile_ff is not None else tk_auto
    tm = _round_up(max(8, min(tm, _round_up(M, 8))), 8)
    tk = _round_up(max(128, min(tk, _round_up(dim_ff, 128))), 128)

    m_pad = _round_up(M, tm)
    ff_pad = _round_up(dim_ff, tk)

    # Pad M with zero rows (masked off at the end) and dim_ff with zero columns
    # (relu(0) = 0 and zero W2 rows contribute nothing -> exact).
    x_p = x if m_pad == M else jnp.pad(x, ((0, m_pad - M), (0, 0)))
    w1b = w1.astype(jnp.bfloat16)
    w2b = w2.astype(jnp.bfloat16)
    b1f = b1.astype(jnp.float32).reshape(1, -1)
    if ff_pad != dim_ff:
        w1b = jnp.pad(w1b, ((0, 0), (0, ff_pad - dim_ff)))
        w2b = jnp.pad(w2b, ((0, ff_pad - dim_ff), (0, 0)))
        b1f = jnp.pad(b1f, ((0, 0), (0, ff_pad - dim_ff)))
    b2f = b2.astype(jnp.float32).reshape(1, -1)

    grid = (m_pad // tm, ff_pad // tk)

    if out_dtype == jnp.float32:
        kernel = ffn_kernel_f32out
        scratch = []
    else:
        kernel = ffn_kernel_acc
        scratch = [pltpu.VMEM((tm, dim_in), jnp.float32)]

    cost = pl.CostEstimate(
        flops=4 * m_pad * dim_in * ff_pad,
        transcendentals=0,
        bytes_accessed=(m_pad * dim_in * (x_bytes + out_bytes)
                        + grid[0] * 2 * dim_in * ff_pad * 2   # W1+W2 per M tile
                        + ff_pad * 4 + dim_in * 4),
    )

    out = pl.pallas_call(
        kernel,
        out_shape=jax.ShapeDtypeStruct((m_pad, dim_in), out_dtype),
        grid_spec=pltpu.PrefetchScalarGridSpec(
            num_scalar_prefetch=0,
            grid=grid,
            in_specs=[
                pl.BlockSpec((tm, dim_in), lambda i, k: (i, 0)),   # x row tile
                pl.BlockSpec((dim_in, tk), lambda i, k: (0, k)),   # W1 ff slice
                pl.BlockSpec((1, tk),      lambda i, k: (0, k)),   # b1 ff slice
                pl.BlockSpec((tk, dim_in), lambda i, k: (k, 0)),   # W2 ff slice
                pl.BlockSpec((1, dim_in),  lambda i, k: (0, 0)),   # b2 (invariant)
            ],
            out_specs=pl.BlockSpec((tm, dim_in), lambda i, k: (i, 0)),
            scratch_shapes=scratch,
        ),
        compiler_params=pltpu.CompilerParams(
            dimension_semantics=("parallel", "arbitrary"),
            vmem_limit_bytes=vmem_limit,
        ),
        cost_estimate=cost,
    )(x_p, w1b, b1f, w2b, b2f)

    return out[:M]


if __name__ == "__main__":
    # Small shapes consistent with the module's forward (last dim = dim_input).
    batch, seq = 2, 8
    dim_input, dim_feedforward = 128, 256

    key = jax.random.PRNGKey(0)
    kx, k1, kb1, k2, kb2 = jax.random.split(key, 5)

    bound1 = 1.0 / dim_input ** 0.5
    bound2 = 1.0 / dim_feedforward ** 0.5

    x = jax.random.normal(kx, (batch, seq, dim_input), dtype=jnp.float32)
    w1 = jax.random.uniform(k1, (dim_input, dim_feedforward), jnp.float32, -bound1, bound1)
    b1 = jax.random.uniform(kb1, (dim_feedforward,), jnp.float32, -bound1, bound1)
    w2 = jax.random.uniform(k2, (dim_feedforward, dim_input), jnp.float32, -bound2, bound2)
    b2 = jax.random.uniform(kb2, (dim_input,), jnp.float32, -bound2, bound2)

    x2d = x.reshape(batch * seq, dim_input)
    out2d = feed_forward(x2d, w1, b1, w2, b2)
    out = out2d.reshape(batch, seq, dim_input)
    jax.block_until_ready(out)

    # Correctness vs an f32 reference of the same math.  Kernel uses bf16 MXU
    # operands with f32 accumulation, so a correspondingly loose tolerance.
    ref = jnp.maximum(x2d @ w1 + b1, 0.0) @ w2 + b2
    err = float(jnp.max(jnp.abs(out2d - ref)))
    assert jnp.allclose(out2d, ref, atol=3e-2, rtol=3e-2), f"max abs err {err}"

    print("KERNEL_OK")
</pallas_src>

<mosaic_0001>
module attributes {stable_mosaic.version = 11 : i64} {
  func.func @ffn_kernel_f32out(%arg0: i32, %arg1: i32, %arg2: memref<16x128xf32, #tpu.memory_space<vmem>>, %arg3: memref<128x256xbf16, #tpu.memory_space<vmem>>, %arg4: memref<1x256xf32, #tpu.memory_space<vmem>>, %arg5: memref<256x128xbf16, #tpu.memory_space<vmem>>, %arg6: memref<1x128xf32, #tpu.memory_space<vmem>>, %arg7: memref<16x128xf32, #tpu.memory_space<vmem>>) attributes {dimension_semantics = [#tpu.dimension_semantics<parallel>, #tpu.dimension_semantics<arbitrary>], iteration_bounds = array<i64: 1, 1>, scalar_prefetch = 0 : i64, scratch_operands = 0 : i64, tpu.core_type = #tpu.core_type<tc>, window_params = [{transform_indices = @transform_0, window_bounds = array<i64: 16, 128>}, {transform_indices = @transform_1, window_bounds = array<i64: 128, 256>}, {transform_indices = @transform_2, window_bounds = array<i64: 1, 256>}, {transform_indices = @transform_3, window_bounds = array<i64: 256, 128>}, {pipeline_mode = #tpu.pipeline_mode<synchronous>, transform_indices = @transform_4, window_bounds = array<i64: 1, 128>}, {transform_indices = @transform_5, window_bounds = array<i64: 16, 128>}]} {
    %c0_i32 = arith.constant 0 : i32
    %0 = arith.cmpi eq, %arg1, %c0_i32 : i32
    %1 = arith.extui %0 : i1 to i32
    %c0_i32_0 = arith.constant 0 : i32
    %2 = arith.cmpi ne, %1, %c0_i32_0 : i32
    scf.if %2 {
      %c0_14 = arith.constant 0 : index
      %c0_15 = arith.constant 0 : index
      %18 = vector.load %arg6[%c0_14, %c0_15] : memref<1x128xf32, #tpu.memory_space<vmem>>, vector<1x128xf32>
      %19 = vector.shape_cast %18 : vector<1x128xf32> to vector<1x128xf32>
      %20 = vector.broadcast %19 : vector<1x128xf32> to vector<16x128xf32>
      %c0_16 = arith.constant 0 : index
      %c0_17 = arith.constant 0 : index
      %21 = vector.load %arg7[%c0_16, %c0_17] : memref<16x128xf32, #tpu.memory_space<vmem>>, vector<16x128xf32>
      tpu.vector_store %arg7[%c0_16, %c0_17], %20 {strides = array<i32>} : memref<16x128xf32, #tpu.memory_space<vmem>>, vector<16x128xf32>,
    } else {
    }
    %c0 = arith.constant 0 : index
    %c0_1 = arith.constant 0 : index
    %3 = vector.load %arg2[%c0, %c0_1] : memref<16x128xf32, #tpu.memory_space<vmem>>, vector<16x128xf32>
    %4 = arith.truncf %3 : vector<16x128xf32> to vector<16x128xbf16>
    %c0_2 = arith.constant 0 : index
    %c0_3 = arith.constant 0 : index
    %5 = vector.load %arg3[%c0_2, %c0_3] : memref<128x256xbf16, #tpu.memory_space<vmem>>, vector<128x256xbf16>
    %cst = arith.constant dense<0.000000e+00> : vector<16x256xf32>
    %6 = tpu.matmul %4, %5, %cst {dimension_numbers = #tpu.dot_dimension_numbers<[1], [0], [0], [1], [0, 0, 1, 1], [], []>} : vector<16x128xbf16>, vector<128x256xbf16>, vector<16x256xf32> -> vector<16x256xf32>
    %c0_4 = arith.constant 0 : index
    %c0_5 = arith.constant 0 : index
    %7 = vector.load %arg4[%c0_4, %c0_5] : memref<1x256xf32, #tpu.memory_space<vmem>>, vector<1x256xf32>
    %8 = vector.broadcast %7 : vector<1x256xf32> to vector<16x256xf32>
    %9 = arith.addf %6, %8 : vector<16x256xf32>
    %cst_6 = arith.constant 0.000000e+00 : f32
    %10 = vector.broadcast %cst_6 : f32 to vector<16x256xf32>
    %11 = arith.maximumf %9, %10 : vector<16x256xf32>
    %c0_7 = arith.constant 0 : index
    %c0_8 = arith.constant 0 : index
    %12 = vector.load %arg7[%c0_7, %c0_8] : memref<16x128xf32, #tpu.memory_space<vmem>>, vector<16x128xf32>
    %13 = arith.truncf %11 : vector<16x256xf32> to vector<16x256xbf16>
    %c0_9 = arith.constant 0 : index
    %c0_10 = arith.constant 0 : index
    %14 = vector.load %arg5[%c0_9, %c0_10] : memref<256x128xbf16, #tpu.memory_space<vmem>>, vector<256x128xbf16>
    %cst_11 = arith.constant dense<0.000000e+00> : vector<16x128xf32>
    %15 = tpu.matmul %13, %14, %cst_11 {dimension_numbers = #tpu.dot_dimension_numbers<[1], [0], [0], [1], [0, 0, 1, 1], [], []>} : vector<16x256xbf16>, vector<256x128xbf16>, vector<16x128xf32> -> vector<16x128xf32>
    %16 = arith.addf %12, %15 : vector<16x128xf32>
    %c0_12 = arith.constant 0 : index
    %c0_13 = arith.constant 0 : index
    %17 = vector.load %arg7[%c0_12, %c0_13] : memref<16x128xf32, #tpu.memory_space<vmem>>, vector<16x128xf32>
    tpu.vector_store %arg7[%c0_12, %c0_13], %16 {strides = array<i32>} : memref<16x128xf32, #tpu.memory_space<vmem>>, vector<16x128xf32>,
    return
  }
  func.func @transform_0(%arg0: i32, %arg1: i32) -> (i32, i32) {
    %c0_i32 = arith.constant 0 : i32
    %c0_i32_0 = arith.constant 0 : i32
    return %arg0, %c0_i32 : i32, i32
  }
  func.func @transform_1(%arg0: i32, %arg1: i32) -> (i32, i32) {
    %c0_i32 = arith.constant 0 : i32
    %c0_i32_0 = arith.constant 0 : i32
    return %c0_i32, %arg1 : i32, i32
  }
  func.func @transform_2(%arg0: i32, %arg1: i32) -> (i32, i32) {
    %c0_i32 = arith.constant 0 : i32
    %c0_i32_0 = arith.constant 0 : i32
    return %c0_i32, %arg1 : i32, i32
  }
  func.func @transform_3(%arg0: i32, %arg1: i32) -> (i32, i32) {
    %c0_i32 = arith.constant 0 : i32
    %c0_i32_0 = arith.constant 0 : i32
    return %arg1, %c0_i32 : i32, i32
  }
  func.func @transform_4(%arg0: i32, %arg1: i32) -> (i32, i32) {
    %c0_i32 = arith.constant 0 : i32
    %c0_i32_0 = arith.constant 0 : i32
    %c0_i32_1 = arith.constant 0 : i32
    return %c0_i32, %c0_i32_0 : i32, i32
  }
  func.func @transform_5(%arg0: i32, %arg1: i32) -> (i32, i32) {
    %c0_i32 = arith.constant 0 : i32
    %c0_i32_0 = arith.constant 0 : i32
    return %arg0, %c0_i32 : i32, i32
  }
}

</mosaic_0001>

<bundles_post_ra>
// kernel: tpu_custom_call.1
= control target key start
LH: loop header
LB: loop body
LE: loop exit
PB: predicated region body
PF: predicated region fallthrough
CT: control target
= control target key end

     0   :  { %10 = vsyncpa [#allocation3], 0  ;;  %s736_s0 = inlined_call_operand.hbm [shape: f32[16,128], index: 0, kind: input, shape index: {}]   ;;  %s737_s1 = inlined_call_operand.hbm [shape: bf16[128,256], index: 1, kind: input, shape index: {}]   ;;  %s738_s2 = inlined_call_operand.vmem [shape: f32[1,256], index: 2, kind: input, shape index: {}]   ;;  %s739_s3 = inlined_call_operand.hbm [shape: bf16[256,128], index: 3, kind: input, shape index: {}]   ;;  %s740_s4 = inlined_call_operand.vmem [shape: f32[1,128], index: 4, kind: input, shape index: {}]   ;;  %s741_s5 = inlined_call_operand.hbm [shape: f32[16,128], index: 5, kind: output, shape index: {}]  }
   0x1   :  { %11 = vsyncpa [#allocation6], 0 }
   0x2   :  { %12 = vsyncpa [#allocation4], 0  ;;  %s627_s18 = smov [#allocation5]   ;;  %s628_s20 = smov [#allocation2]  }
   0x3   :  { %s30_s19 = sshll.u32 %s627_s18, 4  ;;  %s18_s21 = sshll.u32 %s628_s20, 4  ;;  %s31_s19 = int_to_ptr.vmem [resolvable:$true] %s30_s19  ;;  %s666_s21 = int_to_ptr.vmem [resolvable:$true] %s18_s21 }
   0x4   :  { %s533_s24 = scalar_lea.hbm %s737_s1, 2048 }
   0x5   :  { %p534_p0 = scmp.ne.s32.totalorder %s737_s1, %s533_s24  ;;  %p537_p1 = scmp.lt.u32.totalorder %s533_s24, %s737_s1 }
   0x7   :  { %p539_p2 = pnand %p537_p1, %p534_p0 }
   0x9   :  { %542 = shalt.err (!%p539_p2)
}
   0xa   :  { %s543_s29 = scalar_lea.vmem %s31_s19, 2048  ;;  %p548_p4 = scmp.lt.s32.totalorder %s31_s19, %s31_s19 }
   0xb   :  { %p544_p3 = scmp.ne.s32.totalorder %s31_s19, %s543_s29  ;;  %p549_p5 = scmp.lt.s32.totalorder %s543_s29, %s543_s29 }
   0xd   :  { %p550_p6 = por %p549_p5, %p548_p4 }
   0xf   :  { %p551_p7 = pnand %p550_p6, %p544_p3 }
  0x11   :  { %554 = shalt.err (!%p551_p7)
}
  0x12   :  { %s629_s30 = smov 128   ;;  %s630_s6 = smov 8  }
  0x13   :  { %36 = dma.hbm_to_vmem [thread:$0]  %s737_s1, 2048, %s31_s19, [#allocation6], %s629_s30, %s629_s30, %s630_s6  }
  0x14   :  { %s555_s11 = scalar_lea.hbm %s736_s0, 256 }
  0x15   :  { %p556_p8 = scmp.ne.s32.totalorder %s736_s0, %s555_s11  ;;  %p559_p9 = scmp.lt.u32.totalorder %s555_s11, %s736_s0 }
  0x17   :  { %p561_p10 = pnand %p559_p9, %p556_p8 }
  0x19   :  { %564 = shalt.err (!%p561_p10)
}
  0x1a   :  { %s565_s16 = scalar_lea.vmem %s666_s21, 256  ;;  %p570_p12 = scmp.lt.s32.totalorder %s666_s21, %s666_s21 }
  0x1b   :  { %p566_p11 = scmp.ne.s32.totalorder %s666_s21, %s565_s16  ;;  %p571_p13 = scmp.lt.s32.totalorder %s565_s16, %s565_s16 }
  0x1d   :  { %p572_p0 = por %p571_p13, %p570_p12 }
  0x1f   :  { %p573_p1 = pnand %p572_p0, %p566_p11 }
  0x21   :  { %576 = shalt.err (!%p573_p1)
}
  0x22   :  { %24 = dma.hbm_to_vmem [thread:$0]  %s736_s0, 256, %s666_s21, [#allocation3], %s629_s30, %s629_s30, %s630_s6  }
  0x23   :  { %s631_s18 = smov [#allocation7]   ;;  %s577_s23 = scalar_lea.hbm %s739_s3, 2048 }
  0x24   :  { %s44_s19 = sshll.u32 %s631_s18, 4  ;;  %p578_p2 = scmp.ne.s32.totalorder %s739_s3, %s577_s23  ;;  %s45_s19 = int_to_ptr.vmem [resolvable:$true] %s44_s19 }
  0x25   :  { %p581_p3 = scmp.lt.u32.totalorder %s577_s23, %s739_s3 }
  0x27   :  { %p583_p4 = pnand %p581_p3, %p578_p2 }
  0x29   :  { %586 = shalt.err (!%p583_p4)
}
  0x2a   :  { %s587_s28 = scalar_lea.vmem %s45_s19, 2048  ;;  %p592_p6 = scmp.lt.s32.totalorder %s45_s19, %s45_s19 }
  0x2b   :  { %p588_p5 = scmp.ne.s32.totalorder %s45_s19, %s587_s28  ;;  %p593_p7 = scmp.lt.s32.totalorder %s587_s28, %s587_s28 }
  0x2d   :  { %p594_p8 = por %p593_p7, %p592_p6 }
  0x2f   :  { %p595_p9 = pnand %p594_p8, %p588_p5 }
  0x31   :  { %598 = shalt.err (!%p595_p9)
}
  0x32   :  { %s632_s0 = smov 64   ;;  %s633_s21 = smov 4  }
  0x33   :  { %50 = dma.hbm_to_vmem [thread:$0]  %s739_s3, 2048, %s45_s19, [#allocation6], %s632_s0, %s632_s0, %s633_s21  }
  0x34   :  { %621 = dma.done.wait [#allocation3], 256  }
  0x35   :  { %622 = vsyncadd [#allocation3], 4294967040 }
  0x36   :  { %623 = dma.done.wait [#allocation6], 4096  }
  0x37   :  { %624 = vsyncadd [#allocation6], 4294963200  ;;  %v634_v0 = vmov 0   ;;  %v493_v1 = vld [vmem:[#allocation5 + $0x4] ss:$8 sps:$4 sm:$0xff]   ;;  %v521_v16 = vld [vmem:[#allocation7 + $0x50] sm:$0xff]   ;;  %v97_v36 = vlaneseq }
  0x38   :  { %219 = vmatprep.mubr.bf16.mxu0 %v634_v0  ;;  %v495_v2 = vld [vmem:[#allocation5] ss:$8 sps:$4 sm:$0xff]   ;;  %187 = vmatprep.subr.bf16.mxu0 %v493_v1  ;;  %v496_v3 = vld [vmem:[#allocation5 + $0x14] ss:$8 sps:$4 sm:$0xff]   ;;  %v498_v4 = vld [vmem:[#allocation5 + $0x10] ss:$8 sps:$4 sm:$0xff]  }
  0x39   :  { %188 = vmatpush1.bf16.msra.mxu0 %v495_v2  ;;  %v499_v5 = vld [vmem:[#allocation5 + $0x24] ss:$8 sps:$4 sm:$0xff]   ;;  %v501_v6 = vld [vmem:[#allocation5 + $0x20] ss:$8 sps:$4 sm:$0xff]   ;;  %v502_v7 = vld [vmem:[#allocation5 + $0x34] ss:$8 sps:$4 sm:$0xff]  }
  0x3a   :  { %189 = vmatprep.subr.bf16.mxu0 %v496_v3  ;;  %v504_v8 = vld [vmem:[#allocation5 + $0x30] ss:$8 sps:$4 sm:$0xff]   ;;  %v505_v9 = vld [vmem:[#allocation5 + $0x44] ss:$8 sps:$4 sm:$0xff]   ;;  %v507_v11 = vld [vmem:[#allocation5 + $0x40] ss:$8 sps:$4 sm:$0xff]  }
  0x3b   :  { %v517_v10 = vld [vmem:[#allocation7 + $0x40] sm:$0xff]   ;;  %v508_v13 = vld [vmem:[#allocation5 + $0x54] ss:$8 sps:$4 sm:$0xff]   ;;  %v519_v14 = vld [vmem:[#allocation7 + $0x48] sm:$0xff]   ;;  %v98_v37 = vshrl.u32 %v97_v36, 7  ;;  %s635_s10 = smov [#allocation8]  }
  0x3c   :  { %v518_v12 = vld [vmem:[#allocation7] sm:$0xff]   ;;  %462 = vmatprep.subr.bf16.mxu1 %v517_v10  ;;  %v520_v15 = vld [vmem:[#allocation7 + $0x8] sm:$0xff]   ;;  %v510_v17 = vld [vmem:[#allocation5 + $0x50] ss:$8 sps:$4 sm:$0xff]   ;;  %s416_s11 = sshll.u32 %s635_s10, 4  ;;  %s417_s11 = int_to_ptr.vmem [resolvable:$true] %s416_s11 }
  0x3d   :  { %190 = vmatpush1.bf16.msra.mxu0 %v498_v4  ;;  %463 = vmatpush3.bf16.msra.mxu1 %v518_v12  ;;  %v511_v18 = vld [vmem:[#allocation5 + $0x64] ss:$8 sps:$4 sm:$0xff]   ;;  %v522_v19 = vld [vmem:[#allocation7 + $0x10] sm:$0xff]   ;;  %v523_v20 = vld [vmem:[#allocation7 + $0x58] sm:$0xff]   ;;  %v99_v38 = vsub.s32 0, %v98_v37  ;;  %v103_v40 = vsub.s32 1, %v98_v37  ;;  %p604_p11 = scmp.lt.s32.totalorder %s417_s11, %s417_s11 }
  0x3e   :  { %191 = vmatprep.subr.bf16.mxu0 %v499_v5  ;;  %464 = vmatprep.subr.bf16.mxu1 %v519_v14  ;;  %v513_v21 = vld [vmem:[#allocation5 + $0x60] ss:$8 sps:$4 sm:$0xff]   ;;  %v514_v22 = vld [vmem:[#allocation5 + $0x74] ss:$8 sps:$4 sm:$0xff]   ;;  %v516_v25 = vld [vmem:[#allocation5 + $0x70] ss:$8 sps:$4 sm:$0xff]  }
  0x3f   :  { %v524_v23 = vld [vmem:[#allocation7 + $0x18] sm:$0xff]   ;;  %v525_v24 = vld [vmem:[#allocation7 + $0x60] sm:$0xff]   ;;  %v76_v26 = vld [vmem:[#allocation2] sm:$0xff]  ;;  %s599_s12 = scalar_lea.vmem %s417_s11, 256 }
  0x40   :  { %v77_v27 = vld [vmem:[#allocation2 + $0x8] sm:$0xff]  ;;  %v526_v28 = vld [vmem:[#allocation7 + $0x20] sm:$0xff]   ;;  %v527_v29 = vld [vmem:[#allocation7 + $0x68] sm:$0xff]   ;;  %p600_p10 = scmp.ne.s32.totalorder %s417_s11, %s599_s12  ;;  %p605_p12 = scmp.lt.s32.totalorder %s599_s12, %s599_s12 }
  0x41   :  { %192 = vmatpush1.bf16.msra.mxu0 %v501_v6  ;;  %465 = vmatpush3.bf16.msra.mxu1 %v520_v15  ;;  %v78_v30 = vpack.c.bf16 %v77_v27, %v76_v26  ;;  %v528_v31 = vld [vmem:[#allocation7 + $0x28] sm:$0xff]   ;;  %v529_v32 = vld [vmem:[#allocation7 + $0x70] sm:$0xff]   ;;  %v531_v34 = vld [vmem:[#allocation7 + $0x78] sm:$0xff]  }
  0x42   :  { %193 = vmatprep.subr.bf16.mxu0 %v502_v7  ;;  %466 = vmatprep.subr.bf16.mxu1 %v521_v16  ;;  %v530_v33 = vld [vmem:[#allocation7 + $0x30] sm:$0xff]   ;;  %v532_v35 = vld [vmem:[#allocation7 + $0x38] sm:$0xff]   ;;  %p606_p13 = por %p605_p12, %p604_p11 }
  0x43   :  { %v95_v39 = vld [vmem:[%s738_s2] sm:$0x3] }
  0x44   :  { %v100_v41 = vrot.slane %v95_v39, %v99_v38  ;;  %v104_v42 = vrot.slane %v95_v39, %v103_v40  ;;  %v429_v58 = vld [vmem:[%s740_s4] ss:$0 sm:$0xff]  ;;  %p607_p0 = pnand %p606_p13, %p600_p10 }
  0x45   :  { %194 = vmatpush1.bf16.msra.mxu0 %v504_v8  ;;  %467 = vmatpush3.bf16.msra.mxu1 %v522_v19 }
  0x46   :  { %195 = vmatprep.subr.bf16.mxu0 %v505_v9  ;;  %468 = vmatprep.subr.bf16.mxu1 %v523_v20 }
  0x49   :  { %196 = vmatpush1.bf16.msra.mxu0 %v507_v11  ;;  %469 = vmatpush3.bf16.msra.mxu1 %v524_v23 }
  0x4a   :  { %197 = vmatprep.subr.bf16.mxu0 %v508_v13  ;;  %470 = vmatprep.subr.bf16.mxu1 %v525_v24 }
  0x4d   :  { %198 = vmatpush1.bf16.msra.mxu0 %v510_v17  ;;  %471 = vmatpush3.bf16.msra.mxu1 %v526_v28 }
  0x4e   :  { %199 = vmatprep.subr.bf16.mxu0 %v511_v18  ;;  %472 = vmatprep.subr.bf16.mxu1 %v527_v29 }
  0x51   :  { %200 = vmatpush1.bf16.msra.mxu0 %v513_v21  ;;  %473 = vmatpush3.bf16.msra.mxu1 %v528_v31 }
  0x52   :  { %201 = vmatprep.subr.bf16.mxu0 %v514_v22  ;;  %474 = vmatprep.subr.bf16.mxu1 %v529_v32 }
  0x55   :  { %202 = vmatpush1.bf16.msra.mxu0 %v516_v25  ;;  %475 = vmatpush3.bf16.msra.mxu1 %v530_v33 }
  0x56   :  { %476 = vmatprep.subr.bf16.mxu1 %v531_v34 }
  0x58   :  { %220 = vmatmul.mubr.bf16.vlgmr.msra.gmra.mrb[0].mxu0 %v78_v30 }
  0x59   :  { %477 = vmatpush3.bf16.msra.mxu1 %v532_v35 }
 0x12b   :  { %v221_v43 = vpop.f32.mrb[0].mxu0 }
 0x12c   :  { %v222_v44 = vadd.f32 %v221_v43, %v100_v41  ;;  %v223_v45 = vpop.f32.mrb[1].mxu0 }
 0x12d   :  { %v224_v46 = vadd.f32 %v223_v45, %v104_v42  ;;  %v225_v47 = vpop.f32.mrb[2].mxu0 }
 0x12e   :  { %v226_v48 = vadd.f32 %v225_v47, %v100_v41  ;;  %v227_v49 = vpop.f32.mrb[3].mxu0  ;;  %v230_v51 = vmax.f32 %v222_v44, 0.0 }
 0x12f   :  { %v228_v50 = vadd.f32 %v227_v49, %v104_v42  ;;  %v231_v53 = vmax.f32 %v224_v46, 0.0 }
 0x130   :  { %v232_v52 = vmax.f32 %v226_v48, 0.0 }
 0x131   :  { %v233_v54 = vmax.f32 %v228_v50, 0.0 }
 0x132   :  { %v236_v55 = vpack.c.bf16 %v232_v52, %v230_v51 }
 0x133   :  { %v237_v56 = vpack.c.bf16 %v233_v54, %v231_v53 }
 0x135   :  { %398 = vmatprep.mubr.bf16.mxu1 %v237_v56 }
 0x136   :  { %399 = vmatmul.mubr.bf16.vlgmr.msra.gmra.mrb[0].mxu1 %v236_v55 }
 0x209   :  { %v478_v57 = vpop.f32.mrb[0].mxu1 }
 0x20a   :  { %v479_v59 = vpop.f32.mrb[1].mxu1 }
 0x20b   :  { %v480_v60 = vadd.f32 %v479_v59, %v478_v57  ;;  %v481_v61 = vpop.f32.mrb[2].mxu1 }
 0x20c   :  { %v482_v62 = vpop.f32.mrb[3].mxu1 }
 0x20d   :  { %v407_v63 = vadd.f32 %v480_v60, %v429_v58  ;;  %v483_v0 = vadd.f32 %v482_v62, %v481_v61 }
 0x20f   :  { %409 = vst [vmem:[#allocation8] sm:$0xff] %v407_v63  ;;  %v408_v1 = vadd.f32 %v483_v0, %v429_v58 }
 0x211   :  { %410 = vst [vmem:[#allocation8 + $0x8] sm:$0xff] %v408_v1 }
 0x212   :  { %610 = shalt.err (!%p607_p0)
}
 0x213   :  { %s611_s14 = scalar_lea.hbm %s741_s5, 256 }
 0x214   :  { %p612_p1 = scmp.ne.s32.totalorder %s741_s5, %s611_s14  ;;  %p615_p2 = scmp.lt.u32.totalorder %s611_s14, %s741_s5 }
 0x216   :  { %p617_p3 = pnand %p615_p2, %p612_p1 }
 0x218   :  { %620 = shalt.err (!%p617_p3)
}
 0x219   :  { %422 = dma.vmem_to_hbm [thread:$0]  %s417_s11, 256, %s741_s5, [#allocation4], %s629_s30, %s629_s30, %s630_s6  }
 0x21a   :  { %625 = dma.done.wait [#allocation4], 256  }
 0x21b   :  { %626 = vsyncadd [#allocation4], 4294967040 }
 0x21c   :  { %426 = vsyncpa [#allocation3], 1 }
 0x21d   :  { %427 = vsyncpa [#allocation6], 1 }
 0x21e   :  { %428 = vsyncpa [#allocation4], 1 }

</bundles_post_ra>
